<compile_context>
chip_gen: v5e
topology: v5e:2x2
jax: 0.10.0
libtpu: 0.0.40
codegen_flags: <defaults>
</compile_context>

<pallas_src>
import functools

import jax
import jax.numpy as jnp
from jax.experimental import pallas as pl
from jax.experimental.pallas import tpu as pltpu


def _flash_attention_kernel(q_ref, k_ref, v_ref, wo_ref, bo_ref, o_ref,
                            m_scr, l_scr, acc_scr, *, heads, dim_head):
    """One grid step: (batch b, query tile qi, kv tile ki).  ki is innermost."""
    ki = pl.program_id(2)
    nk = pl.num_programs(2)

    # ---- init running stats once per (b, q tile) --------------------------
    @pl.when(ki == 0)
    def _init():
        m_scr[...] = jnp.full(m_scr.shape, -jnp.inf, jnp.float32)
        l_scr[...] = jnp.zeros(l_scr.shape, jnp.float32)
        acc_scr[...] = jnp.zeros(acc_scr.shape, jnp.float32)

    # Tiles arrive pre-projected, pre-scaled and already laid out (H, T, dh):
    # no projection matmuls and no reshape/transpose in the hot loop.
    q = q_ref[0]                                                   # (H, TQ, dh)
    k = k_ref[0]                                                   # (H, TK, dh)
    v = v_ref[0]                                                   # (H, TK, dh)

    # ---- scores: heads batched, contraction over dim_head (no explicit K^T)
    s = jnp.einsum('hqd,hkd->hqk', q, k,
                   preferred_element_type=jnp.float32)             # (H, TQ, TK) f32

    # ---- online softmax update (stats kept in f32) -------------------------
    m_prev = m_scr[...]                                            # (H, TQ, 1)
    m_new = jnp.maximum(m_prev, s.max(axis=-1, keepdims=True))
    alpha = jnp.exp(m_prev - m_new)
    p = jnp.exp(s - m_new)                                         # (H, TQ, TK)
    l_scr[...] = alpha * l_scr[...] + p.sum(axis=-1, keepdims=True)
    acc_scr[...] = alpha * acc_scr[...] + jnp.einsum(
        'hqk,hkd->hqd', p.astype(v.dtype), v,                      # bf16 MXU feed
        preferred_element_type=jnp.float32)
    m_scr[...] = m_new

    # ---- finalize once per q tile: normalize, merge heads, single GEMM -----
    @pl.when(ki == nk - 1)
    def _finalize():
        inv_l = pl.reciprocal(l_scr[...], approx=True)             # EUP vrcp
        out_h = acc_scr[...] * inv_l                               # (H, TQ, dh) f32
        tq = out_h.shape[1]
        # One transpose per q tile, then one inner-deep matmul that fills the
        # MXU (instead of H shallow dh-deep matmuls + cross-head reduce).
        out = out_h.transpose(1, 0, 2).reshape(tq, heads * dim_head)
        y = jnp.dot(out.astype(wo_ref.dtype), wo_ref[...],
                    preferred_element_type=jnp.float32)
        y = y + bo_ref[...]                                        # (TQ, Dq)
        # TODO(synk): for query_dim < 128 this store is a masked vst; a
        # lane-dense output slab would need wrapper-side layout plumbing.
        o_ref[0] = y.astype(o_ref.dtype)
    # TODO(synk): optional `mask` / cross-attention `context` paths not wired
    # (module defaults: context=x, mask=None, drop_path=Identity).


def attention_forward(x, w_q, w_kv, w_out, b_out, *, heads, dim_head,
                      block_q=128, block_kv=256,
                      compute_dtype=jnp.bfloat16):
    """x: (B, N, query_dim) -> (B, N, query_dim).  Self-attention, no mask."""
    B, N, Dq = x.shape
    inner = heads * dim_head
    scale = dim_head ** -0.5

    block_q = min(block_q, N)
    block_kv = min(block_kv, N)
    assert N % block_q == 0 and N % block_kv == 0, "N must divide by the tiles"
    assert block_q == N or block_q % 8 == 0
    assert block_kv == N or block_kv % 8 == 0

    # Host-side (free) weight split of the fused kv projection.
    w_k = w_kv[:, :inner]
    w_v = w_kv[:, inner:]

    # Hoisted projections: plain XLA GEMMs run ONCE (not once per kv step),
    # pre-laid-out (B, H, N, dh) so the kernel sees MXU-ready tiles with zero
    # in-kernel relayout.  The softmax scale is folded into q.
    def to_bhnd(t):
        return t.reshape(B, N, heads, dim_head).transpose(0, 2, 1, 3)

    q = to_bhnd((x @ w_q) * scale).astype(compute_dtype)
    k = to_bhnd(x @ w_k).astype(compute_dtype)
    v = to_bhnd(x @ w_v).astype(compute_dtype)
    w_out_c = w_out.astype(compute_dtype)            # bf16 halves its VMEM cost
    b_out2d = b_out.reshape(1, Dq).astype(jnp.float32)

    grid = (B, N // block_q, N // block_kv)
    kernel = functools.partial(_flash_attention_kernel, heads=heads,
                               dim_head=dim_head)

    # Per-generation VMEM budget: double-buffered tiles + weights + scratch +
    # f32 score temporaries, capped at ~3/4 of physical VMEM (v7x 64 MiB,
    # v5e/v6e 128 MiB).  Scratch / temporaries are NOT double-counted.
    cb = jnp.dtype(compute_dtype).itemsize
    xb = jnp.dtype(x.dtype).itemsize
    est = (
        2 * cb * heads * (block_q + 2 * block_kv) * dim_head   # q/k/v tiles (x2 bufs)
        + 2 * xb * block_q * Dq                                # out tile (x2 bufs)
        + 2 * (cb * inner * Dq + 4 * Dq)                       # W_out / b_out (x2 bufs)
        + 4 * heads * block_q * (dim_head + 2)                 # f32 scratch (1 buf)
        + 4 * 4 * heads * block_q * block_kv)                  # f32 score temporaries
    try:
        cap = int(pltpu.get_tpu_info().vmem_capacity_bytes) * 3 // 4
    except Exception:  # conservative fallback (fits v7x's 64 MiB physical)
        cap = 48 << 20
    vmem_limit = int(min(max(est + (4 << 20), 16 << 20), cap))
    # TODO(synk): W_out/b_out have constant index maps; pin them single-buffered
    # via pipeline_mode=pl.Buffered(1) to reclaim another copy of the weights.

    return pl.pallas_call(
        kernel,
        out_shape=jax.ShapeDtypeStruct((B, N, Dq), x.dtype),
        grid_spec=pltpu.PrefetchScalarGridSpec(
            num_scalar_prefetch=0,
            grid=grid,
            in_specs=[
                pl.BlockSpec((1, heads, block_q, dim_head),
                             lambda b, qi, ki: (b, 0, qi, 0)),        # Q tiles
                pl.BlockSpec((1, heads, block_kv, dim_head),
                             lambda b, qi, ki: (b, 0, ki, 0)),        # K tiles
                pl.BlockSpec((1, heads, block_kv, dim_head),
                             lambda b, qi, ki: (b, 0, ki, 0)),        # V tiles
                pl.BlockSpec((inner, Dq), lambda b, qi, ki: (0, 0)),  # W_out
                pl.BlockSpec((1, Dq), lambda b, qi, ki: (0, 0)),      # b_out
            ],
            out_specs=pl.BlockSpec((1, block_q, Dq),
                                   lambda b, qi, ki: (b, qi, 0)),
            scratch_shapes=[
                pltpu.VMEM((heads, block_q, 1), jnp.float32),         # running max
                pltpu.VMEM((heads, block_q, 1), jnp.float32),         # running sum
                pltpu.VMEM((heads, block_q, dim_head), jnp.float32),  # output acc
            ]),
        compiler_params=pltpu.CompilerParams(
            dimension_semantics=("parallel", "parallel", "arbitrary"),
            vmem_limit_bytes=vmem_limit),
    )(q, k, v, w_out_c, b_out2d)


def attention_reference(x, w_q, w_kv, w_out, b_out, *, heads, dim_head):
    """Pure-JAX reference mirroring the PyTorch forward."""
    B, N, Dq = x.shape
    inner = heads * dim_head
    scale = dim_head ** -0.5
    q = x @ w_q                                # (B, N, inner)
    kv = x @ w_kv                              # (B, N, 2*inner)
    k, v = kv[..., :inner], kv[..., inner:]

    def split_heads(t):                        # 'b n (h d) -> (b h) n d'
        return t.reshape(B, N, heads, dim_head).transpose(0, 2, 1, 3).reshape(
            B * heads, N, dim_head)

    q, k, v = map(split_heads, (q, k, v))
    sim = jnp.einsum('bid,bjd->bij', q, k) * scale
    attn = jax.nn.softmax(sim, axis=-1)
    out = jnp.einsum('bij,bjd->bid', attn, v)
    out = out.reshape(B, heads, N, dim_head).transpose(0, 2, 1, 3).reshape(B, N, inner)
    return out @ w_out + b_out


if __name__ == "__main__":
    # small shapes consistent with the module
    B, N = 2, 16
    query_dim = 32
    heads, dim_head = 2, 16
    inner = heads * dim_head

    key = jax.random.PRNGKey(0)
    kx, kq, kkv, ko, kb = jax.random.split(key, 5)

    x = jax.random.normal(kx, (B, N, query_dim), dtype=jnp.float32)
    # deterministic synthetic parameters (nn.Linear weights stored transposed
    # as (in, out) so the projection is `x @ W`)
    w_q = jax.random.normal(kq, (query_dim, inner), dtype=jnp.float32) * 0.05
    w_kv = jax.random.normal(kkv, (query_dim, 2 * inner), dtype=jnp.float32) * 0.05
    w_out = jax.random.normal(ko, (inner, query_dim), dtype=jnp.float32) * 0.05
    b_out = jax.random.normal(kb, (query_dim,), dtype=jnp.float32) * 0.05

    y_ref = attention_reference(x, w_q, w_kv, w_out, b_out,
                                heads=heads, dim_head=dim_head)

    # block_q = block_kv = 8 -> grid (2, 2, 2): exercises the online-softmax
    # accumulation across multiple KV tiles and parallel batch/query tiles.

    # 1) default bf16-MXU path (production configuration)
    y = attention_forward(x, w_q, w_kv, w_out, b_out,
                          heads=heads, dim_head=dim_head,
                          block_q=8, block_kv=8)
    y = jax.block_until_ready(y)
    assert y.shape == (B, N, query_dim)
    assert jnp.allclose(y, y_ref, atol=2e-2, rtol=2e-2), "bf16 path mismatch"

    # 2) f32 path for tight numerical parity with the module
    y32 = attention_forward(x, w_q, w_kv, w_out, b_out,
                            heads=heads, dim_head=dim_head,
                            block_q=8, block_kv=8,
                            compute_dtype=jnp.float32)
    y32 = jax.block_until_ready(y32)
    assert jnp.allclose(y32, y_ref, atol=5e-3, rtol=5e-3), "f32 path mismatch"

    print("KERNEL_OK")
</pallas_src>

<mosaic_0001>
module attributes {stable_mosaic.version = 11 : i64} {
  func.func @_flash_attention_kernel(%arg0: i32, %arg1: i32, %arg2: i32, %arg3: memref<1x2x8x16xbf16, #tpu.memory_space<vmem>>, %arg4: memref<1x2x8x16xbf16, #tpu.memory_space<vmem>>, %arg5: memref<1x2x8x16xbf16, #tpu.memory_space<vmem>>, %arg6: memref<32x32xbf16, #tpu.memory_space<vmem>>, %arg7: memref<1x32xf32, #tpu.memory_space<vmem>>, %arg8: memref<1x8x32xf32, #tpu.memory_space<vmem>>, %arg9: memref<2x8x1xf32, #tpu.memory_space<vmem>>, %arg10: memref<2x8x1xf32, #tpu.memory_space<vmem>>, %arg11: memref<2x8x16xf32, #tpu.memory_space<vmem>>) attributes {dimension_semantics = [#tpu.dimension_semantics<parallel>, #tpu.dimension_semantics<parallel>, #tpu.dimension_semantics<arbitrary>], iteration_bounds = array<i64: 2, 2, 2>, scalar_prefetch = 0 : i64, scratch_operands = 3 : i64, tpu.core_type = #tpu.core_type<tc>, window_params = [{transform_indices = @transform_0, window_bounds = array<i64: 1, 2, 8, 16>}, {transform_indices = @transform_1, window_bounds = array<i64: 1, 2, 8, 16>}, {transform_indices = @transform_2, window_bounds = array<i64: 1, 2, 8, 16>}, {pipeline_mode = #tpu.pipeline_mode<synchronous>, transform_indices = @transform_3, window_bounds = array<i64: 32, 32>}, {pipeline_mode = #tpu.pipeline_mode<synchronous>, transform_indices = @transform_4, window_bounds = array<i64: 1, 32>}, {transform_indices = @transform_5, window_bounds = array<i64: 1, 8, 32>}]} {
    %c0_i32 = arith.constant 0 : i32
    %0 = arith.cmpi eq, %arg2, %c0_i32 : i32
    %1 = arith.extui %0 : i1 to i32
    %c0_i32_0 = arith.constant 0 : i32
    %2 = arith.cmpi ne, %1, %c0_i32_0 : i32
    scf.if %2 {
      %cst_34 = arith.constant 0xFF800000 : f32
      %36 = vector.broadcast %cst_34 : f32 to vector<2x8x1xf32>
      %c0_35 = arith.constant 0 : index
      %c0_36 = arith.constant 0 : index
      %c0_37 = arith.constant 0 : index
      %37 = vector.load %arg9[%c0_35, %c0_36, %c0_37] : memref<2x8x1xf32, #tpu.memory_space<vmem>>, vector<2x8x1xf32>
      tpu.vector_store %arg9[%c0_35, %c0_36, %c0_37], %36 {strides = array<i32>} : memref<2x8x1xf32, #tpu.memory_space<vmem>>, vector<2x8x1xf32>,
      %cst_38 = arith.constant 0.000000e+00 : f32
      %38 = vector.broadcast %cst_38 : f32 to vector<2x8x1xf32>
      %c0_39 = arith.constant 0 : index
      %c0_40 = arith.constant 0 : index
      %c0_41 = arith.constant 0 : index
      %39 = vector.load %arg10[%c0_39, %c0_40, %c0_41] : memref<2x8x1xf32, #tpu.memory_space<vmem>>, vector<2x8x1xf32>
      tpu.vector_store %arg10[%c0_39, %c0_40, %c0_41], %38 {strides = array<i32>} : memref<2x8x1xf32, #tpu.memory_space<vmem>>, vector<2x8x1xf32>,
      %cst_42 = arith.constant 0.000000e+00 : f32
      %40 = vector.broadcast %cst_42 : f32 to vector<2x8x16xf32>
      %c0_43 = arith.constant 0 : index
      %c0_44 = arith.constant 0 : index
      %c0_45 = arith.constant 0 : index
      %41 = vector.load %arg11[%c0_43, %c0_44, %c0_45] : memref<2x8x16xf32, #tpu.memory_space<vmem>>, vector<2x8x16xf32>
      tpu.vector_store %arg11[%c0_43, %c0_44, %c0_45], %40 {strides = array<i32>} : memref<2x8x16xf32, #tpu.memory_space<vmem>>, vector<2x8x16xf32>,
    } else {
    }
    %c0 = arith.constant 0 : index
    %c0_1 = arith.constant 0 : index
    %c0_2 = arith.constant 0 : index
    %c0_3 = arith.constant 0 : index
    %3 = vector.load %arg3[%c0, %c0_1, %c0_2, %c0_3] : memref<1x2x8x16xbf16, #tpu.memory_space<vmem>>, vector<1x2x8x16xbf16>
    %4 = vector.shape_cast %3 : vector<1x2x8x16xbf16> to vector<2x8x16xbf16>
    %c0_4 = arith.constant 0 : index
    %c0_5 = arith.constant 0 : index
    %c0_6 = arith.constant 0 : index
    %c0_7 = arith.constant 0 : index
    %5 = vector.load %arg4[%c0_4, %c0_5, %c0_6, %c0_7] : memref<1x2x8x16xbf16, #tpu.memory_space<vmem>>, vector<1x2x8x16xbf16>
    %6 = vector.shape_cast %5 : vector<1x2x8x16xbf16> to vector<2x8x16xbf16>
    %c0_8 = arith.constant 0 : index
    %c0_9 = arith.constant 0 : index
    %c0_10 = arith.constant 0 : index
    %c0_11 = arith.constant 0 : index
    %7 = vector.load %arg5[%c0_8, %c0_9, %c0_10, %c0_11] : memref<1x2x8x16xbf16, #tpu.memory_space<vmem>>, vector<1x2x8x16xbf16>
    %8 = vector.shape_cast %7 : vector<1x2x8x16xbf16> to vector<2x8x16xbf16>
    "tpu.trace_start"() <{level = 10 : i32, message = "hqd,hkd->hqk"}> : () -> ()
    %cst = arith.constant dense<0.000000e+00> : vector<2x8x8xf32>
    %9 = tpu.matmul %4, %6, %cst {dimension_numbers = #tpu.dot_dimension_numbers<[2], [2], [1], [1], [0, 0, 0, 1, 1, 1], [0], [0]>} : vector<2x8x16xbf16>, vector<2x8x16xbf16>, vector<2x8x8xf32> -> vector<2x8x8xf32>
    "tpu.trace_stop"() : () -> ()
    %c0_12 = arith.constant 0 : index
    %c0_13 = arith.constant 0 : index
    %c0_14 = arith.constant 0 : index
    %10 = vector.load %arg9[%c0_12, %c0_13, %c0_14] : memref<2x8x1xf32, #tpu.memory_space<vmem>>, vector<2x8x1xf32>
    %cst_15 = arith.constant dense<0xFF800000> : vector<2x8xf32>
    %11 = vector.multi_reduction <maximumf>, %9, %cst_15 [2] : vector<2x8x8xf32> to vector<2x8xf32>
    %12 = vector.shape_cast %11 : vector<2x8xf32> to vector<2x8x1xf32>
    %13 = arith.maximumf %10, %12 : vector<2x8x1xf32>
    %14 = arith.subf %10, %13 : vector<2x8x1xf32>
    %15 = math.exp %14 : vector<2x8x1xf32>
    %16 = vector.broadcast %13 : vector<2x8x1xf32> to vector<2x8x8xf32>
    %17 = arith.subf %9, %16 : vector<2x8x8xf32>
    %18 = math.exp %17 : vector<2x8x8xf32>
    %c0_16 = arith.constant 0 : index
    %c0_17 = arith.constant 0 : index
    %c0_18 = arith.constant 0 : index
    %19 = vector.load %arg10[%c0_16, %c0_17, %c0_18] : memref<2x8x1xf32, #tpu.memory_space<vmem>>, vector<2x8x1xf32>
    %20 = arith.mulf %15, %19 : vector<2x8x1xf32>
    %cst_19 = arith.constant dense<0.000000e+00> : vector<2x8xf32>
    %21 = vector.multi_reduction <add>, %18, %cst_19 [2] : vector<2x8x8xf32> to vector<2x8xf32>
    %22 = vector.shape_cast %21 : vector<2x8xf32> to vector<2x8x1xf32>
    %23 = arith.addf %20, %22 : vector<2x8x1xf32>
    %c0_20 = arith.constant 0 : index
    %c0_21 = arith.constant 0 : index
    %c0_22 = arith.constant 0 : index
    %24 = vector.load %arg10[%c0_20, %c0_21, %c0_22] : memref<2x8x1xf32, #tpu.memory_space<vmem>>, vector<2x8x1xf32>
    tpu.vector_store %arg10[%c0_20, %c0_21, %c0_22], %23 {strides = array<i32>} : memref<2x8x1xf32, #tpu.memory_space<vmem>>, vector<2x8x1xf32>,
    %c0_23 = arith.constant 0 : index
    %c0_24 = arith.constant 0 : index
    %c0_25 = arith.constant 0 : index
    %25 = vector.load %arg11[%c0_23, %c0_24, %c0_25] : memref<2x8x16xf32, #tpu.memory_space<vmem>>, vector<2x8x16xf32>
    %26 = vector.broadcast %15 : vector<2x8x1xf32> to vector<2x8x16xf32>
    %27 = arith.mulf %26, %25 : vector<2x8x16xf32>
    %28 = arith.truncf %18 : vector<2x8x8xf32> to vector<2x8x8xbf16>
    "tpu.trace_start"() <{level = 10 : i32, message = "hqk,hkd->hqd"}> : () -> ()
    %cst_26 = arith.constant dense<0.000000e+00> : vector<2x8x16xf32>
    %29 = tpu.matmul %28, %8, %cst_26 {dimension_numbers = #tpu.dot_dimension_numbers<[2], [1], [1], [2], [0, 0, 0, 1, 1, 2], [0], [0]>} : vector<2x8x8xbf16>, vector<2x8x16xbf16>, vector<2x8x16xf32> -> vector<2x8x16xf32>
    "tpu.trace_stop"() : () -> ()
    %30 = arith.addf %27, %29 : vector<2x8x16xf32>
    %c0_27 = arith.constant 0 : index
    %c0_28 = arith.constant 0 : index
    %c0_29 = arith.constant 0 : index
    %31 = vector.load %arg11[%c0_27, %c0_28, %c0_29] : memref<2x8x16xf32, #tpu.memory_space<vmem>>, vector<2x8x16xf32>
    tpu.vector_store %arg11[%c0_27, %c0_28, %c0_29], %30 {strides = array<i32>} : memref<2x8x16xf32, #tpu.memory_space<vmem>>, vector<2x8x16xf32>,
    %c0_30 = arith.constant 0 : index
    %c0_31 = arith.constant 0 : index
    %c0_32 = arith.constant 0 : index
    %32 = vector.load %arg9[%c0_30, %c0_31, %c0_32] : memref<2x8x1xf32, #tpu.memory_space<vmem>>, vector<2x8x1xf32>
    tpu.vector_store %arg9[%c0_30, %c0_31, %c0_32], %13 {strides = array<i32>} : memref<2x8x1xf32, #tpu.memory_space<vmem>>, vector<2x8x1xf32>,
    %c1_i32 = arith.constant 1 : i32
    %33 = arith.cmpi eq, %arg2, %c1_i32 : i32
    %34 = arith.extui %33 : i1 to i32
    %c0_i32_33 = arith.constant 0 : i32
    %35 = arith.cmpi ne, %34, %c0_i32_33 : i32
    scf.if %35 {
      %c0_34 = arith.constant 0 : index
      %c0_35 = arith.constant 0 : index
      %c0_36 = arith.constant 0 : index
      %36 = vector.load %arg10[%c0_34, %c0_35, %c0_36] : memref<2x8x1xf32, #tpu.memory_space<vmem>>, vector<2x8x1xf32>
      %37 = tpu.reciprocal %36 {approx = true} : vector<2x8x1xf32> -> vector<2x8x1xf32>
      %c0_37 = arith.constant 0 : index
      %c0_38 = arith.constant 0 : index
      %c0_39 = arith.constant 0 : index
      %38 = vector.load %arg11[%c0_37, %c0_38, %c0_39] : memref<2x8x16xf32, #tpu.memory_space<vmem>>, vector<2x8x16xf32>
      %39 = vector.broadcast %37 : vector<2x8x1xf32> to vector<2x8x16xf32>
      %40 = arith.mulf %38, %39 : vector<2x8x16xf32>
      %41 = tpu.transpose %40, [1, 0, 2] : vector<2x8x16xf32> -> vector<8x2x16xf32>
      %42 = vector.shape_cast %41 : vector<8x2x16xf32> to vector<8x32xf32>
      %43 = arith.truncf %42 : vector<8x32xf32> to vector<8x32xbf16>
      %c0_40 = arith.constant 0 : index
      %c0_41 = arith.constant 0 : index
      %44 = vector.load %arg6[%c0_40, %c0_41] : memref<32x32xbf16, #tpu.memory_space<vmem>>, vector<32x32xbf16>
      %cst_42 = arith.constant dense<0.000000e+00> : vector<8x32xf32>
      %45 = tpu.matmul %43, %44, %cst_42 {dimension_numbers = #tpu.dot_dimension_numbers<[1], [0], [0], [1], [0, 0, 1, 1], [], []>} : vector<8x32xbf16>, vector<32x32xbf16>, vector<8x32xf32> -> vector<8x32xf32>
      %c0_43 = arith.constant 0 : index
      %c0_44 = arith.constant 0 : index
      %46 = vector.load %arg7[%c0_43, %c0_44] : memref<1x32xf32, #tpu.memory_space<vmem>>, vector<1x32xf32>
      %47 = vector.broadcast %46 : vector<1x32xf32> to vector<8x32xf32>
      %48 = arith.addf %45, %47 : vector<8x32xf32>
      %c0_45 = arith.constant 0 : index
      %c0_46 = arith.constant 0 : index
      %c0_47 = arith.constant 0 : index
      %49 = vector.load %arg8[%c0_45, %c0_46, %c0_47] : memref<1x8x32xf32, #tpu.memory_space<vmem>>, vector<1x8x32xf32>
      %50 = vector.shape_cast %49 : vector<1x8x32xf32> to vector<8x32xf32>
      %51 = vector.shape_cast %48 : vector<8x32xf32> to vector<1x8x32xf32>
      tpu.vector_store %arg8[%c0_45, %c0_46, %c0_47], %51 {strides = array<i32>} : memref<1x8x32xf32, #tpu.memory_space<vmem>>, vector<1x8x32xf32>,
    } else {
    }
    return
  }
  func.func @transform_0(%arg0: i32, %arg1: i32, %arg2: i32) -> (i32, i32, i32, i32) {
    %c0_i32 = arith.constant 0 : i32
    %c0_i32_0 = arith.constant 0 : i32
    %c0_i32_1 = arith.constant 0 : i32
    return %arg0, %c0_i32, %arg1, %c0_i32_0 : i32, i32, i32, i32
  }
  func.func @transform_1(%arg0: i32, %arg1: i32, %arg2: i32) -> (i32, i32, i32, i32) {
    %c0_i32 = arith.constant 0 : i32
    %c0_i32_0 = arith.constant 0 : i32
    %c0_i32_1 = arith.constant 0 : i32
    return %arg0, %c0_i32, %arg2, %c0_i32_0 : i32, i32, i32, i32
  }
  func.func @transform_2(%arg0: i32, %arg1: i32, %arg2: i32) -> (i32, i32, i32, i32) {
    %c0_i32 = arith.constant 0 : i32
    %c0_i32_0 = arith.constant 0 : i32
    %c0_i32_1 = arith.constant 0 : i32
    return %arg0, %c0_i32, %arg2, %c0_i32_0 : i32, i32, i32, i32
  }
  func.func @transform_3(%arg0: i32, %arg1: i32, %arg2: i32) -> (i32, i32) {
    %c0_i32 = arith.constant 0 : i32
    %c0_i32_0 = arith.constant 0 : i32
    %c0_i32_1 = arith.constant 0 : i32
    return %c0_i32, %c0_i32_0 : i32, i32
  }
  func.func @transform_4(%arg0: i32, %arg1: i32, %arg2: i32) -> (i32, i32) {
    %c0_i32 = arith.constant 0 : i32
    %c0_i32_0 = arith.constant 0 : i32
    %c0_i32_1 = arith.constant 0 : i32
    return %c0_i32, %c0_i32_0 : i32, i32
  }
  func.func @transform_5(%arg0: i32, %arg1: i32, %arg2: i32) -> (i32, i32, i32) {
    %c0_i32 = arith.constant 0 : i32
    %c0_i32_0 = arith.constant 0 : i32
    return %arg0, %arg1, %c0_i32 : i32, i32, i32
  }
}

</mosaic_0001>

<bundles_post_ra>
// kernel: tpu_custom_call.1
= control target key start
LH: loop header
LB: loop body
LE: loop exit
PB: predicated region body
PF: predicated region fallthrough
CT: control target
= control target key end

     0   :  { %s1749_s0 = inlined_call_operand.hbm [shape: bf16[2,2,16,16], index: 0, kind: input, shape index: {}]   ;;  %s1750_s1 = inlined_call_operand.hbm [shape: bf16[2,2,16,16], index: 1, kind: input, shape index: {}]   ;;  %s1751_s2 = inlined_call_operand.hbm [shape: bf16[2,2,16,16], index: 2, kind: input, shape index: {}]   ;;  %s1752_s3 = inlined_call_operand.hbm [shape: bf16[32,32], index: 3, kind: input, shape index: {}]   ;;  %s1753_s4 = inlined_call_operand.vmem [shape: f32[1,32], index: 4, kind: input, shape index: {}]   ;;  %s1754_s5 = inlined_call_operand.hbm [shape: f32[2,16,32], index: 5, kind: output, shape index: {}]  }
   0x1   :  { %1781 = sst [smem:[#allocation34_spill]] %s1750_s1 }
   0x2   :  { %1782 = sst [smem:[#allocation35_spill]] %s1751_s2 }
   0x3   :  { %1783 = sst [smem:[#allocation36_spill]] %s1752_s3 }
   0x4   :  { %1784 = sst [smem:[#allocation37_spill]] %s1753_s4 }
   0x5   :  { %1785 = sst [smem:[#allocation38_spill]] %s1754_s5 }
   0x6   :  { %10 = vsyncpa [#allocation6], 0 }
   0x7   :  { %12 = vsyncpa [#allocation6 + $0x1], 0 }
   0x8   :  { %13 = vsyncpa [#allocation9], 0 }
   0x9   :  { %15 = vsyncpa [#allocation9 + $0x1], 0 }
   0xa   :  { %16 = vsyncpa [#allocation12], 0 }
   0xb   :  { %17 = vsyncpa [#allocation7], 0 }
   0xc   :  { %19 = vsyncpa [#allocation7 + $0x1], 0  ;;  %s1380_s18 = smov 0   ;;  %s1382_s19 = smov 0  }
   0xd   :  { %s1384_s20 = smov 0   ;;  %s1386_s21 = smov 0  }
   0xe   :  { %s1388_s22 = smov 0   ;;  %s1390_s23 = smov 0  }
   0xf   :  { %s1392_s24 = smov 0   ;;  %s1394_s25 = smov 0  }
  0x10   :  { %s1396_s26 = smov 0   ;;  %s1398_s27 = smov 0  }
  0x11   :  { %s1400_s28 = smov 0   ;;  %s1402_s29 = smov 0  }
  0x12   :  { %s1404_s30 = smov 0  }
  0x13 LB: > { %1786 = sst [smem:[#allocation18_spill]] %s1293_s19  ;;  %s37_s6 = sadd.s32 1, %s1325_s27  ;;  %s1337_s30 = sphi %s1404_s30, %s25_s30   ;;  %s1333_s29 = sphi %s1402_s29, %s1844_s29   ;;  %s1329_s28 = sphi %s1400_s28, %s1852_s28   ;;  %s1325_s27 = sphi %s1398_s27, %s1851_s27   ;;  %s1321_s26 = sphi %s1396_s26, %s1842_s26   ;;  %s1317_s25 = sphi %s1394_s25, %s1841_s25   ;;  %s1313_s24 = sphi %s1392_s24, %s1850_s24   ;;  %s1309_s23 = sphi %s1390_s23, %s1849_s23   ;;  %s1305_s22 = sphi %s1388_s22, %s1848_s22   ;;  %s1301_s21 = sphi %s1386_s21, %s1840_s21   ;;  %s1297_s20 = sphi %s1384_s20, %s1847_s20   ;;  %s1293_s19 = sphi %s1382_s19, %s1846_s19   ;;  %s1289_s18 = sphi %s1380_s18, %s1839_s18  }
  0x14   : > { %1787 = sst [smem:[#allocation19_spill]] %s1301_s21  ;;  %p1447_p0 = scmp.ge.s32.totalorder %s37_s6, 2 }
  0x15   : > { %1788 = sst [smem:[#allocation20_spill]] %s1305_s22  ;;  %p61_p1 = scmp.eq.s32.totalorder %s1337_s30, 0 }
  0x16   : > { %1789 = sst [smem:[#allocation21_spill]] %s1313_s24  ;;  %p88_p2 = scmp.ne.s32.totalorder %s1297_s20, %s1293_s19 }
  0x17   : > { %1790 = sst [smem:[#allocation22_spill]] %s1317_s25  ;;  %s1854_s6 = smov (%p1447_p0, %s37_s6), 0 }
  0x18   : > { %1791 = sst [smem:[#allocation23_spill]] %s1321_s26  ;;  %p1461_p3 = por %p88_p2, %p61_p1 }
  0x19   : > { %1792 = sst [smem:[#allocation24_spill]] %s1329_s28  ;;  %p1757_p4 = scmp.lt.s32.totalorder %s1337_s30, 8 }
  0x1a   : > { %1793 = sst [smem:[#allocation25_spill]] %s1333_s29  ;;  %s1756_s12 = sshll.u32 %s1333_s29, 2 }
  0x1b   : > { %s256_s13 = sand.u32 1, %s1337_s30   ;;  %s258_s14 = sand.u32 1, %s1297_s20  }
  0x1c   : > { %s871_s15 = sshll.u32 %s258_s14, 3  ;;  %s264_s16 = sadd.s32 %s1325_s27, %s1756_s12 }
  0x1d   : > { %s873_s17 = sshll.u32 %s264_s16, 2  ;;  %s260_s9 = scalar_lea.vmem [#allocation8], %s871_s15 }
  0x1e   : > { %s269_s7 = sshll.u32 %s260_s9, 4  ;;  %s1796_s1 = sld [smem:[#allocation34_spill]]  ;;  %s270_s7 = int_to_ptr.vmem [resolvable:$true] %s269_s7 }
  0x1f   : > { %p1481_p5 = pnand %p1757_p4, %p1461_p3  ;;  %s1798_s2 = sld [smem:[#allocation35_spill]] }
  0x20   : > { %s1488_s25 = scalar_lea.sflag [#allocation9], %s256_s13  ;;  %s1761_s10 = smov 64  }
  0x21   : > { %s1763_s16 = smov 4   ;;  %s1502_s13 = sadd.s32 4294967295, %s1337_s30  }
  0x22   : > { %1800 = sst [smem:[#allocation27_spill]] %s1502_s13  ;;  %p66_p6 = scmp.ne.s32.totalorder %s1305_s22, %s1301_s21 }
  0x23   : > { %p67_p7 = scmp.eq.s32.totalorder %s1502_s13, 0  ;;  %p94_p8 = scmp.ne.s32.totalorder %s1293_s19, %s1289_s18 }
  0x24   : > { %s266_s26 = scalar_lea.hbm %s1796_s1, %s873_s17  ;;  %s283_s1 = scalar_lea.vmem [#allocation10], %s871_s15 }
  0x25   : > { %s267_s4 = sshll.u32 %s266_s26, 4  ;;  %s289_s5 = scalar_lea.hbm %s1798_s2, %s873_s17  ;;  %s268_s4 = int_to_ptr.hbm [resolvable:$true] %s267_s4 }
  0x26   : > { %s1758_s26 = smov 128   ;;  %s290_s12 = sshll.u32 %s289_s5, 4  ;;  %s1498_s12 = int_to_ptr.hbm [resolvable:$true] %s290_s12 }
  0x27   : > { %927 = dma.hbm_to_vmem [thread:$0]  (!%p1481_p5), %s268_s4, 128, %s270_s7, %s1488_s25, %s1758_s26, %s1761_s10, %s1763_s16  }
  0x28   : > { %s1496_s24 = sshll.u32 %s283_s1, 4  ;;  %s864_s17 = sadd.s32 4294967294, %s1337_s30  }
  0x29   : > { %1799 = sst [smem:[#allocation26_spill]] %s1496_s24  ;;  %p190_p9 = scmp.eq.s32.totalorder %s1502_s13, 7 }
  0x2a   : > { %p1513_p10 = por %p67_p7, %p66_p6  ;;  %p196_p11 = scmp.eq.s32.totalorder %s864_s17, 7 }
  0x2b   : > { %p1519_p12 = por %p94_p8, %p67_p7  ;;  %p865_p13 = scmp.ge.s32.totalorder %s1337_s30, 1 }
  0x2c   : > { %s1801_s1 = scalar_select %p1513_p10, 1, 0 }
  0x2d   : > { %s1803_s4 = scalar_select %p1519_p12, 1, 0 }
  0x2e   : > { %1802 = sst [smem:[#allocation28_spill]] %s1801_s1  ;;  %p1524_p2 = por %p196_p11, %p66_p6 }
  0x2f   : > { %1804 = sst [smem:[#allocation29_spill]] %s1803_s4  ;;  %p203_p3 = scmp.lt.s32.totalorder %s1337_s30, 9 }
  0x30   : > { %s1805_s18 = scalar_select %p1524_p2, 1, 0 }
  0x31   : > { %s1807_s3 = sld [smem:[#allocation36_spill]]  ;;  %p1532_p4 = pnand %p865_p13, %p203_p3 }
  0x32   : > { %1806 = sst [smem:[#allocation30_spill]] %s1805_s18  ;;  %s1342_s5 = smov [#allocation11]  }
  0x33   : > { %p917_p6 = pneg %p1532_p4  ;;  %s216_s17 = sshll.u32 %s1342_s5, 4  ;;  %s217_s17 = int_to_ptr.vmem [resolvable:$true] %s216_s17 }
  0x34   : > { %s40_s7 = sadd.s32 1, %s1329_s28  ;;  %s53_s15 = sadd.s32 1, %s1309_s23 }
  0x35   : > { %p918_p8 = pnand %p917_p6, %p67_p7  ;;  %s1856_s7 = smov (!%p1447_p0, %s40_s7), %s1329_s28 }
  0x36   : > { %p60_p11 = scmp.ne.s32.totalorder %s1309_s23, %s1305_s22  ;;  %s233_s26 = sand.u32 1, %s1309_s23  }
  0x37   : > { %s214_s14 = sshll.u32 %s1807_s3, 4  ;;  %p42_p13 = scmp.ge.s32.totalorder %s1856_s7, 2  ;;  %s215_s14 = int_to_ptr.hbm [resolvable:$true] %s214_s14 }
  0x38   : > { %920 = dma.hbm_to_vmem [thread:$0]  (!%p918_p8), %s215_s14, 256, %s217_s17, [#allocation12], %s1761_s10, %s1761_s10, %s1763_s16  }
  0x39   : > { %p1553_p3 = por %p61_p1, %p60_p11  ;;  %p1559_p6 = por %p190_p9, %p60_p11 }
  0x3a   : > { %s1858_s7 = smov (%p42_p13, %s1856_s7), 0  ;;  %s1813_s8 = sadd.s32 1, %s1333_s29 }
  0x3b   : > { %s1810_s24 = scalar_select %p1559_p6, 1, 0 }
  0x3c   : > { %1812 = sst [smem:[#allocation32_spill]] %s1858_s7  ;;  %s1860_s8 = smov (!%p42_p13, %s1813_s8), %s1333_s29 }
  0x3d   : > { %1811 = sst [smem:[#allocation31_spill]] %s1810_s24  ;;  %s49_s14 = ssub.s32 %s1329_s28, %s1858_s7 }
  0x3e   : > { %s868_s17 = sshll.u32 %s233_s26, 3  ;;  %p46_p0 = scmp.ge.s32.totalorder %s1860_s8, 2 }
  0x3f   : > { %s1814_s10 = sshll.u32 %s1333_s29, 2  ;;  %s237_s2 = scalar_lea.vmem [#allocation5], %s868_s17 }
  0x40   : > { %s241_s16 = sadd.s32 %s1329_s28, %s1814_s10  ;;  %s246_s3 = sshll.u32 %s237_s2, 4  ;;  %s247_s3 = int_to_ptr.vmem [resolvable:$true] %s246_s3 }
  0x41   : > { %s1862_s8 = smov (%p46_p0, %s1860_s8), 0  ;;  %s1816_s18 = sld [smem:[#allocation26_spill]] }
  0x42   : > { %1815 = sst [smem:[#allocation33_spill]] %s1862_s8  ;;  %s870_s21 = sshll.u32 %s241_s16, 2 }
  0x43   : > { %s48_s7 = ssub.s32 %s1333_s29, %s1862_s8  ;;  %s243_s19 = scalar_lea.hbm %s1749_s0, %s870_s21 }
  0x44   : > { %s50_s13 = sor.u32 %s49_s14, %s48_s7  ;;  %s1817_s1 = ssub.s32 %s1325_s27, %s1854_s6 }
  0x45   : > { %s78_s22 = sor.u32 %s1817_s1, %s48_s7  ;;  %p51_p1 = scmp.eq.s32.totalorder %s50_s13, 0 }
  0x46   : > { %p79_p9 = scmp.eq.s32.totalorder %s78_s22, 0  ;;  %s244_s2 = sshll.u32 %s243_s19, 4  ;;  %s245_s2 = int_to_ptr.hbm [resolvable:$true] %s244_s2 }
  0x47   : > { %p1818_p8 = scmp.lt.s32.totalorder %s1337_s30, 8  ;;  %s1819_s17 = sadd.s32 1, %s1297_s20 }
  0x48   : > { %s1588_s10 = scalar_select %p51_p1, %s1309_s23, %s53_s15  }
  0x49   : > { %p922_p11 = pnand %p1818_p8, %p1553_p3  ;;  %s234_s16 = scalar_lea.sflag [#allocation6], %s233_s26 }
  0x4a   : > { %s1593_s28 = scalar_select %p79_p9, %s1297_s20, %s1819_s17  }
  0x4b   : > { %s1820_s8 = smov 4   ;;  %s1821_s29 = smov 64  }
  0x4c   : > { %s1822_s24 = smov 128   ;;  %s1823_s21 = int_to_ptr.vmem [resolvable:$true] %s1816_s18 }
  0x4d   : > { %924 = dma.hbm_to_vmem [thread:$0]  (!%p922_p11), %s245_s2, 128, %s247_s3, %s234_s16, %s1822_s24, %s1821_s29, %s1820_s8  }
  0x4e   : > { %930 = dma.hbm_to_vmem [thread:$0]  (!%p1481_p5), %s1498_s12, 128, %s1823_s21, %s1488_s25, %s1822_s24, %s1821_s29, %s1820_s8  }
  0x4f   : > { %304 = sbr.rel (%p1532_p4) target bundleno = 1082 (0x43a), region = 40  ;;  %s1824_s19 = sld [smem:[#allocation20_spill]] (!%p1532_p4) }
  0x55   : > { %s1610_s13 = sand.u32 1, %s1824_s19  }
  0x56   : > { %s878_s26 = sshll.u32 %s1610_s13, 3  ;;  %s307_s1 = scalar_lea.sflag [#allocation6], %s1610_s13 }
  0x57   : > { %s1614_s4 = scalar_lea.vmem [#allocation5], %s878_s26 }
  0x58   : > { %1272 = dma.done.wait (%p1513_p10), %s307_s1, 128  }
  0x59   : > { %1274 = vsyncadd (%p1513_p10), %s307_s1, 4294967168  ;;  %s1826_s3 = sld [smem:[#allocation27_spill]] }
  0x5a   : > { %s1827_s29 = sld [smem:[#allocation18_spill]] }
  0x5f   : > { %s316_s12 = sand.u32 1, %s1826_s3  }
  0x60   : > { %s318_s25 = sand.u32 1, %s1827_s29   ;;  %s317_s9 = scalar_lea.sflag [#allocation9], %s316_s12 }
  0x61   : > { %s1622_s18 = sshll.u32 %s318_s25, 3 }
  0x62   : > { %s320_s7 = scalar_lea.vmem [#allocation8], %s1622_s18 }
  0x63   : > { %1276 = dma.done.wait (%p1519_p12), %s317_s9, 256  }
  0x64   : > { %1278 = vsyncadd (%p1519_p12), %s317_s9, 4294967040  ;;  %s330_s15 = scalar_lea.vmem [#allocation10], %s1622_s18 }
  0x65   : > { %1280 = dma.done.wait (%p67_p7), [#allocation12], 256  }
  0x66   : > { %1282 = vsyncadd (%p67_p7), [#allocation12], 4294967040  ;;  %s1634_s5 = scalar_lea.vmem [#allocation13], %s878_s26  ;;  %s1829_s8 = sld [smem:[#allocation21_spill]] }
  0x6c   : > { %p883_p4 = scmp.ne.s32.totalorder %s1829_s8, 0 }
  0x6e   : > { %377 = sbr.rel (%p883_p4) target bundleno = 122 (0x7a), region = 60 }
  0x73   : > { %vm378_vm0 = vcmask 7168   ;;  %v1343_v0 = vmov -inf   ;;  %vm383_vm1 = vcmask 130048   ;;  %v1344_v1 = vmov 0.0  }
  0x74   : > { %379 = vst.msk [vmem:[#allocation2] sm:$0xff] %vm378_vm0, %v1343_v0 }
  0x75   : > { %380 = vst.msk [vmem:[#allocation2 + $0x8] sm:$0xff] %vm378_vm0, %v1343_v0 }
  0x76   : > { %381 = vst.msk [vmem:[#allocation3] sm:$0xff] %vm378_vm0, %v1344_v1 }
  0x77   : > { %382 = vst.msk [vmem:[#allocation3 + $0x8] sm:$0xff] %vm378_vm0, %v1344_v1 }
  0x78   : > { %384 = vst.msk [vmem:[#allocation4] sm:$0xff] %vm383_vm1, %v1344_v1 }
  0x79   : > { %385 = vst.msk [vmem:[#allocation4 + $0x8] sm:$0xff] %vm383_vm1, %v1344_v1 }
  0x7a PF: > { %v388_v2 = vld [vmem:[%s320_s7] sm:$0xf]  ;;  %vm392_vm2 = vcmask 130048   ;;  %v389_v3 = vld [vmem:[%s320_s7 + $0x4] sm:$0xf]  ;;  %vm433_vm3 = vcmask 64512  }
  0x7b   : > { %v397_v4 = vsel %vm392_vm2, %v388_v2, 0  ;;  %v416_v5 = vsel %vm392_vm2, %v389_v3, 0  ;;  %v386_v6 = vld [vmem:[%s1614_s4] sm:$0xf]  ;;  %v387_v7 = vld [vmem:[%s1614_s4 + $0x4] sm:$0xf] }
  0x7c   : > { %406 = vmatpush.bf16.xpose.msra.mxu0 %v397_v4  ;;  %425 = vmatpush.bf16.xpose.msra.mxu1 %v416_v5  ;;  %v1345_v14 = vmov 0   ;;  %v431_v15 = vld [vmem:[#allocation2] sm:$0xff]  ;;  %vm476_vm4 = vcmask 7168   ;;  %v432_v20 = vld [vmem:[#allocation2 + $0x8] sm:$0xff]  ;;  %v390_v27 = vld [vmem:[%s330_s15] sm:$0xf] }
  0x7d   : > { %1054 = vset.pattern.permute.xlu1 %v1345_v14  ;;  %1055 = vset.pattern.permute.xlu2 %v1345_v14  ;;  %vm498_vm5 = vcmask 1043456   ;;  %v391_v29 = vld [vmem:[%s330_s15 + $0x4] sm:$0xf]  ;;  %s1830_s14 = sld [smem:[#allocation21_spill]] }
  0x7e   : > { %1056 = vset.pattern.permute.xlu0 %v1345_v14  ;;  %v500_v28 = vsel %vm498_vm5, %v390_v27, 0  ;;  %v519_v30 = vsel %vm498_vm5, %v391_v29, 0  ;;  %v464_v43 = vld [vmem:[#allocation3] sm:$0xff]  ;;  %v465_v47 = vld [vmem:[#allocation3 + $0x8] sm:$0xff] }
  0x7f   : > { %509 = vmatpush.bf16.msra.mxu2 %v500_v28  ;;  %528 = vmatpush.bf16.msra.mxu3 %v519_v30  ;;  %v479_v52 = vld [vmem:[#allocation4] sm:$0xff] }
  0x80   : > { %v480_v56 = vld [vmem:[#allocation4 + $0x8] sm:$0xff] }
  0x83   : > { %884 = vmatmul.msk.bf16.vlgmr.msra.gmra.mxu0 %vm392_vm2, %v386_v6  ;;  %885 = vmatmul.msk.bf16.vlgmr.msra.gmra.mxu1 %vm392_vm2, %v387_v7  ;;  %p888_p5 = scmp.ne.s32.totalorder %s1830_s14, 1 }
  0x84   : > { %s1349_s2 = smov (!%p888_p5), 16   ;;  %s1831_s24 = sld [smem:[#allocation37_spill]] (!%p888_p5) }
 0x100   : > { %v408_v8 = vpop.f32.mrf.mxu0  ;;  %v427_v9 = vpop.f32.mrf.mxu1 }
 0x101   : > { %v434_v10 = vsel %vm433_vm3, %v408_v8, -inf  ;;  %v437_v11 = vsel %vm433_vm3, %v427_v9, -inf }
 0x102   : > { %435 = vmax.xlane.f32.xlu0 %v434_v10 }
 0x108   : > { %v410_v12 = vpop.f32.mrf.mxu0  ;;  %v429_v13 = vpop.f32.mrf.mxu1 }
 0x10a   : > { %438 = vmax.xlane.f32.xlu0 %v437_v11 }
 0x175   : > { %v436_v16 = vpop.xlane.xlu0 %435 }
 0x176   : > { %v440_v17 = vmax.f32 %v431_v15, %v436_v16 }
 0x178   : > { %v442_v18 = vsub.f32 %v431_v15, %v440_v17  ;;  %538 = vst.msk [vmem:[#allocation2] sm:$0xff] %vm476_vm4, %v440_v17  ;;  %450 = vperm.xlu1 %1054, %v440_v17  }
 0x17a   : > { %v444_v19 = vmul.f32 1.442695, %v442_v18 }
 0x17c   : > { %1057 = vpow2.f32 %v444_v19 }
 0x17d   : > { %v439_v21 = vpop.xlane.xlu0 %438 }
 0x17e   : > { %v441_v22 = vmax.f32 %v432_v20, %v439_v21 }
 0x180   : > { %v443_v23 = vsub.f32 %v432_v20, %v441_v22  ;;  %539 = vst.msk [vmem:[#allocation2 + $0x8] sm:$0xff] %vm476_vm4, %v441_v22  ;;  %455 = vperm.xlu1 %1054, %v441_v22  }
 0x182   : > { %v1058_v24 = vpop.eup %1057  ;;  %v446_v25 = vmul.f32 1.442695, %v443_v23 }
 0x183   : > { %483 = vperm.xlu2 %1055, %v1058_v24   ;;  %v466_v44 = vmul.f32 %v1058_v24, %v464_v43 }
 0x184   : > { %1059 = vpow2.f32 %v446_v25 }
 0x18a   : > { %v1060_v26 = vpop.eup %1059 }
 0x18b   : > { %488 = vperm.xlu2 %1055, %v1060_v26   ;;  %v467_v48 = vmul.f32 %v1060_v26, %v465_v47 }
 0x1dd   : > { %v484_v51 = vpop.permute.xlu2 %483 }
 0x1de   : > { %v491_v53 = vmul.f32 %v484_v51, %v479_v52 }
 0x1e5   : > { %v489_v57 = vpop.permute.xlu2 %488 }
 0x1e6   : > { %v492_v58 = vmul.f32 %v489_v57, %v480_v56 }
 0x1ea   : > { %v451_v31 = vpop.permute.xlu1 %450 }
 0x1eb   : > { %v458_v32 = vsub.f32 %v408_v8, %v451_v31 }
 0x1ed   : > { %v460_v33 = vmul.f32 1.442695, %v458_v32 }
 0x1ef   : > { %1061 = vpow2.f32 %v460_v33 }
 0x1f2   : > { %v456_v34 = vpop.permute.xlu1 %455 }
 0x1f3   : > { %v459_v35 = vsub.f32 %v427_v9, %v456_v34 }
 0x1f5   : > { %v1062_v36 = vpop.eup %1061  ;;  %v462_v37 = vmul.f32 1.442695, %v459_v35 }
 0x1f6   : > { %v468_v38 = vsel %vm433_vm3, %v1062_v36, 0.0  ;;  %v493_v39 = vpack.c.bf16 %v1062_v36, %v1062_v36 }
 0x1f7   : > { %1063 = vpow2.f32 %v462_v37  ;;  %469 = vadd.xlane.f32.xlu0 %v468_v38 }
 0x1f8   : > { %886 = vmatmul.msk.bf16.vlgmr.msra.gmra.mxu2 %vm433_vm3, %v493_v39 }
 0x1fd   : > { %v1064_v40 = vpop.eup %1063 }
 0x1fe   : > { %v471_v41 = vsel %vm433_vm3, %v1064_v40, 0.0  ;;  %v494_v42 = vpack.c.bf16 %v1064_v40, %v1064_v40 }
 0x1ff   : > { %472 = vadd.xlane.f32.xlu1 %v471_v41 }
 0x200   : > { %887 = vmatmul.msk.bf16.vlgmr.msra.gmra.mxu3 %vm433_vm3, %v494_v42 }
 0x26a   : > { %v470_v45 = vpop.xlane.xlu0 %469 }
 0x26b   : > { %v474_v46 = vadd.f32 %v470_v45, %v466_v44 }
 0x26d   : > { %477 = vst.msk [vmem:[#allocation3] sm:$0xff] %vm476_vm4, %v474_v46 }
 0x272   : > { %v473_v49 = vpop.xlane.xlu1 %472 }
 0x273   : > { %v475_v50 = vadd.f32 %v473_v49, %v467_v48 }
 0x275   : > { %478 = vst.msk [vmem:[#allocation3 + $0x8] sm:$0xff] %vm476_vm4, %v475_v50 }
 0x27b   : > { %v511_v54 = vpop.f32.mrf.mxu2 }
 0x27c   : > { %v534_v55 = vadd.f32 %v511_v54, %v491_v53 }
 0x27e   : > { %536 = vst.msk [vmem:[#allocation4] sm:$0xff] %vm392_vm2, %v534_v55 }
 0x283   : > { %v513_v59 = vpop.f32.mrf.mxu2  ;;  %v530_v60 = vpop.f32.mrf.mxu3 }
 0x284   : > { %v535_v61 = vadd.f32 %v530_v60, %v492_v58 }
 0x286   : > { %537 = vst.msk [vmem:[#allocation4 + $0x8] sm:$0xff] %vm392_vm2, %v535_v61 }
 0x287   : > { %543 = sbr.rel (%p888_p5) target bundleno = 1059 (0x423), region = 64 }
 0x28b   : > { %v532_v62 = vpop.f32.mrf.mxu3 }
 0x28c   : > { %v544_v63 = vld [vmem:[#allocation3] sm:$0xff]  ;;  %v1346_v0 = vmov 0   ;;  %v545_v1 = vld [vmem:[#allocation3 + $0x8] sm:$0xff]  ;;  %v548_v4 = vld [vmem:[#allocation4] sm:$0xff]  ;;  %v1347_v5 = vmov 1983009808  }
 0x28d   : > { %1065 = vset.pattern.permute.xlu0 %v1346_v0  ;;  %1067 = vrcp.f32 %v544_v63  ;;  %v566_v6 = vunpack.c.l.s4 %v1347_v5  ;;  %v904_v9 = vld [vmem:[#allocation11 + $0x8] sm:$0xff]  ;;  %vm563_vm6 = vcmask 1047556   ;;  %v1348_v13 = vmov 1934713408   ;;  %v1066_v5 = vld [vmem:[%s1831_s24] ss:$0 sm:$0xff] }
 0x28e   : > { %1069 = vrcp.f32 %v545_v1  ;;  %689 = vmatpush.bf16.msra.mxu0 %v904_v9  ;;  %v549_v12 = vld [vmem:[#allocation4 + $0x8] sm:$0xff]  ;;  %v588_v14 = vunpack.c.l.s4 %v1348_v13  ;;  %v903_v1 = vld [vmem:[#allocation11] sm:$0xff]  ;;  %vm679_vm7 = vcmask 261120  }
 0x28f   : > { %v567_v10 = vunpack.c.0.s8 %v566_v6 }
 0x290   : > { %v589_v20 = vunpack.c.0.s8 %v588_v14 }
 0x292   : > { %690 = vmatpush.bf16.msra.mxu0 %v903_v1 }
 0x293   : > { %v1068_v2 = vpop.eup %1067 }
 0x294   : > { %552 = vperm.xlu0 %1065, %v1068_v2   ;;  %v1070_v3 = vpop.eup %1069 }
 0x29c   : > { %557 = vperm.xlu0 %1065, %v1070_v3  }
 0x306   : > { %v553_v7 = vpop.permute.xlu0 %552 }
 0x307   : > { %v560_v8 = vmul.f32 %v553_v7, %v548_v4 }
 0x309   : > { %v562_v11 = vrot.slane %v560_v8, 4  ;;  %v568_v16 = vperm.slane %v560_v8, %v567_v10 }
 0x30b   : > { %v564_v15 = vsel %vm563_vm6, 0.0, %v562_v11  ;;  %v585_v21 = vrot.slane %v568_v16, 4 }
 0x30c   : > { %v572_v19 = vperm.slane %v564_v15, %v567_v10 }
 0x30e   : > { %v558_v17 = vpop.permute.xlu0 %557  ;;  %v597_v27 = vrot.slane %v572_v19, 4 }
 0x30f   : > { %v561_v18 = vmul.f32 %v558_v17, %v549_v12 }
 0x311   : > { %v573_v22 = vrot.slane %v561_v18, 4  ;;  %v578_v23 = vperm.slane %v561_v18, %v567_v10 }
 0x313   : > { %v574_v24 = vsel %vm563_vm6, 0.0, %v573_v22  ;;  %v583_v25 = vrot.slane %v578_v23, 4  ;;  %v586_v26 = vsel %vm563_vm6, %v578_v23, %v585_v21 }
 0x314   : > { %v582_v28 = vperm.slane %v574_v24, %v567_v10  ;;  %v594_v29 = vperm.slane %v586_v26, %v589_v20 }
 0x315   : > { %v584_v30 = vsel %vm563_vm6, %v583_v25, %v568_v16 }
 0x316   : > { %v590_v31 = vperm.slane %v584_v30, %v589_v20  ;;  %v595_v32 = vrot.slane %v582_v28, 4  ;;  %v598_v33 = vsel %vm563_vm6, %v582_v28, %v597_v27  ;;  %v609_v34 = vrot.slane %v594_v29, 4 }
 0x317   : > { %v606_v35 = vperm.slane %v598_v33, %v589_v20 }
 0x318   : > { %v596_v36 = vsel %vm563_vm6, %v595_v32, %v572_v19  ;;  %v607_v37 = vrot.slane %v590_v31, 4  ;;  %v610_v38 = vsel %vm563_vm6, 0.0, %v609_v34  ;;  %v615_v45 = vsel %vm563_vm6, %v609_v34, %v590_v31 }
 0x319   : > { %v602_v39 = vperm.slane %v596_v36, %v589_v20  ;;  %v613_v40 = vrot.slane %v606_v35, 4  ;;  %v620_v41 = vrot.slane %v610_v38, 4  ;;  %v619_v50 = vperm.slane %v615_v45, %v567_v10 }
 0x31a   : > { %v608_v42 = vsel %vm563_vm6, 0.0, %v607_v37 }
 0x31b   : > { %v611_v43 = vrot.slane %v602_v39, 4  ;;  %v614_v44 = vsel %vm563_vm6, 0.0, %v613_v40  ;;  %v621_v46 = vsel %vm563_vm6, %v620_v41, %v608_v42  ;;  %v626_v51 = vsel %vm563_vm6, %v613_v40, %v602_v39 }
 0x31c   : > { %v631_v47 = vrot.slane %v614_v44, 4  ;;  %v625_v48 = vperm.slane %v621_v46, %v567_v10  ;;  %v630_v56 = vperm.slane %v626_v51, %v567_v10 }
 0x31d   : > { %v612_v49 = vsel %vm563_vm6, 0.0, %v611_v43 }
 0x31e   : > { %v632_v52 = vsel %vm563_vm6, %v631_v47, %v612_v49  ;;  %v637_v53 = vrot.slane %v625_v48, 4 }
 0x31f   : > { %v636_v54 = vperm.slane %v632_v52, %v567_v10 }
 0x320   : > { %v638_v55 = vsel %vm563_vm6, %v637_v53, %v619_v50 }
 0x321   : > { %v642_v57 = vperm.slane %v638_v55, %v589_v20  ;;  %v643_v58 = vrot.slane %v636_v54, 4 }
 0x323   : > { %v644_v59 = vsel %vm563_vm6, %v643_v58, %v630_v56  ;;  %v651_v60 = vrot.slane %v642_v57, 4 }
 0x324   : > { %v648_v61 = vperm.slane %v644_v59, %v589_v20 }
 0x326   : > { %v652_v62 = vsel %vm563_vm6, %v648_v61, %v651_v60  ;;  %v649_v63 = vrot.slane %v648_v61, 4 }
 0x327   : > { %654 = vrot.lane.b32.xlu1 %v652_v62, %s1349_s2 }
 0x328   : > { %v650_v0 = vsel %vm563_vm6, %v649_v63, %v642_v57 }
 0x399   : > { %v655_v2 = vpop.permute.xlu1 %654 }
 0x39a   : > { %v657_v3 = vsel %vm392_vm2, %v650_v0, %v655_v2 }
 0x39b   : > { %v658_v4 = vpack.c.bf16 %v657_v3, %v657_v3 }
 0x39d   : > { %897 = vmatmul.msk.bf16.vlgmr.msra.gmra.mxu0 %vm679_vm7, %v658_v4 }
 0x41a   : > { %v692_v6 = vpop.f32.mrf.mxu0 }
 0x41b   : > { %v693_v7 = vadd.f32 %v1066_v5, %v692_v6 }
 0x41d   : > { %696 = vst.msk [vmem:[%s1634_s5] sm:$0xff] %vm679_vm7, %v693_v7 }
 0x422   : > { %v694_v8 = vpop.f32.mrf.mxu0 }
 0x423 PF: > { %s1832_s21 = sld [smem:[#allocation23_spill]]  ;;  %s712_s4 = sshll.u32 %s1634_s5, 4  ;;  %s713_s4 = int_to_ptr.vmem [resolvable:$true] %s712_s4 }
 0x424   : > { %s1833_s19 = sld [smem:[#allocation22_spill]]  ;;  %s698_s9 = scalar_lea.sflag [#allocation7], %s1610_s13 }
 0x425   : > { %s1835_s12 = sld [smem:[#allocation38_spill]] }
 0x429   : > { %s899_s26 = sshll.u32 %s1832_s21, 1 }
 0x42a   : > { %s708_s1 = sadd.s32 %s1833_s19, %s899_s26 }
 0x42b   : > { %s900_s3 = sshll.u32 %s708_s1, 3  ;;  %s1211_s5 = scalar_lea.hbm %s1835_s12, 32 }
 0x42c   : > { %s710_s25 = scalar_lea.hbm %s1835_s12, %s900_s3 }
 0x42d   : > { %s714_s18 = sshll.u32 %s710_s25, 4  ;;  %s715_s18 = int_to_ptr.hbm [resolvable:$true] %s714_s18 }
 0x42e   : > { %s1205_s7 = sshra.s32 %s715_s18, 4  ;;  %s1206_s7 = int_to_ptr.hbm [resolvable:$true] %s1205_s7 }
 0x42f   : > { %s1207_s15 = scalar_lea.hbm %s1206_s7, 8  ;;  %p1212_p13 = scmp.lt.s32.totalorder %s1206_s7, %s1835_s12 }
 0x430   : > { %p1208_p7 = scmp.ne.s32.totalorder %s1206_s7, %s1207_s15  ;;  %p1213_p3 = scmp.lt.s32.totalorder %s1211_s5, %s1207_s15 }
 0x432   : > { %p1209_p10 = pnand %p1208_p7, %p1559_p6  ;;  %p1214_p0 = por %p1213_p3, %p1212_p13 }
 0x434   : > { %p1210_p12 = pneg %p1209_p10 }
 0x436   : > { %p1215_p1 = pnand %p1214_p0, %p1210_p12 }
 0x438   : > { %1218 = shalt.err (!%p1215_p1)
}
 0x439   : > { %915 = dma.vmem_to_hbm [thread:$0]  (%p1559_p6), %s713_s4, 128, %s715_s18, %s698_s9  }
 0x43a PF: > { %s1836_s13 = sld [smem:[#allocation19_spill]]  ;;  %p938_p9 = scmp.ge.s32.totalorder %s1337_s30, 2 }
 0x43c   : > { %p932_p8 = pnand %p938_p9, %p1524_p2 }
 0x43e   : > { %p933_p11 = pneg %p932_p8 }
 0x440   : > { %s726_s24 = sand.u32 1, %s1836_s13  }
 0x441   : > { %s727_s21 = scalar_lea.sflag [#allocation7], %s726_s24 }
 0x442   : > { %1284 = dma.done.wait (%p933_p11), %s727_s21, 128  }
 0x443   : > { %1286 = vsyncadd (%p933_p11), %s727_s21, 4294967168  ;;  %s25_s30 = sadd.s32 1, %s1337_s30   ;;  %s1839_s18 = sld [smem:[#allocation18_spill]] }
 0x444   : > { %p1705_p4 = scmp.ge.s32.totalorder %s25_s30, 10   ;;  %s1840_s21 = sld [smem:[#allocation20_spill]] }
 0x445   : > { %s1841_s25 = sld [smem:[#allocation24_spill]]  ;;  %s1846_s19 = smov %s1297_s20 }
 0x446   : > { %s1842_s26 = sld [smem:[#allocation25_spill]]  ;;  %s1847_s20 = smov %s1593_s28 }
 0x447   : > { %s1843_s1 = sld [smem:[#allocation32_spill]]  ;;  %s1848_s22 = smov %s1309_s23 }
 0x448   : > { %s1844_s29 = sld [smem:[#allocation33_spill]]  ;;  %s1849_s23 = smov %s1588_s10 }
 0x449   : > { %s1850_s24 = smov %s1325_s27  ;;  %s1851_s27 = smov %s1854_s6 }
 0x44a   :  { %24 = sbr.rel (!%p1705_p4) target bundleno = 19 (0x13), region = 121 }
 0x44d   : > { %s1852_s28 = smov %s1843_s1 }
 0x44f   :  { %733 = vsyncpa [#allocation6], 1 }
 0x450   :  { %735 = vsyncpa [#allocation6 + $0x1], 1 }
 0x451   :  { %736 = vsyncpa [#allocation9], 1 }
 0x452   :  { %738 = vsyncpa [#allocation9 + $0x1], 1 }
 0x453   :  { %739 = vsyncpa [#allocation12], 1 }
 0x454   :  { %740 = vsyncpa [#allocation7], 1 }
 0x455   :  { %742 = vsyncpa [#allocation7 + $0x1], 1 }

</bundles_post_ra>
